<compile_context>
chip_gen: v6e
topology: v6e:2x2x1
jax: 0.10.0
libtpu: 0.0.40
codegen_flags: <defaults>
</compile_context>

<pallas_src>
import functools
import math

import jax
import jax.numpy as jnp
from jax import lax
from jax.experimental import pallas as pl
from jax.experimental.pallas import tpu as pltpu


def _attn_kernel(hidden_ref, wqkv_ref, bqkv_ref, mask_ref, out_ref, ctx_ref,
                 *, heads_per_block, head_dim, compute_dtype, probs_dtype):
    """One (batch, head-group) tile of BertSelfAttention.

    hidden_ref : [1, S, H]        activations of batch b (compute_dtype)
    wqkv_ref   : [1, H, 3*G*d]    fused Q|K|V weights for this head group
                                  (compute_dtype; 1/sqrt(d) folded into Q)
    bqkv_ref   : [1, 1, 3*G*d]    fused biases (f32; 1/sqrt(d) folded into Q)
    mask_ref   : [1, 1, 1, S]     additive attention mask (f32)
    out_ref    : [1, S, G*d]      context slab, already in final [B, S, H] layout
    ctx_ref    : [S, G*d] f32     VMEM scratch context slab
    """
    G, d = heads_per_block, head_dim
    gd = G * d

    x = hidden_ref[0]                                               # [S, H]
    # Fused QKV projection: one MXU matmul with a wide (3*G*d) N dimension.
    qkv = jnp.dot(x, wqkv_ref[0], preferred_element_type=jnp.float32)
    # Single cast pass over the whole [S, 3*G*d] slab (not 3*G per-head casts).
    qkv = (qkv + bqkv_ref[0]).astype(compute_dtype)

    mask = mask_ref[0, 0]                                           # [1, S] f32

    for h in range(G):                                              # static unroll
        q_h = qkv[:, 0 * gd + h * d: 0 * gd + (h + 1) * d]          # [S, d]
        k_h = qkv[:, 1 * gd + h * d: 1 * gd + (h + 1) * d]          # [S, d]
        v_h = qkv[:, 2 * gd + h * d: 2 * gd + (h + 1) * d]          # [S, d]

        # scores = q @ k^T; 1/sqrt(d) already folded into the query projection.
        # Contract on the last dim of both operands -> no explicit k transpose.
        s = lax.dot_general(q_h, k_h,
                            dimension_numbers=(((1,), (1,)), ((), ())),
                            preferred_element_type=jnp.float32)     # [S, S] f32
        s = s + mask
        s = s - jnp.max(s, axis=-1, keepdims=True)

        # exp in probs_dtype (bf16 on v6e/v7x -> ~2x EUP throughput; f32 on v5e).
        p = jnp.exp(s.astype(probs_dtype))                          # [S, S]
        # Deferred normalization: f32 row sum now, scale the [S, d] context
        # after the p @ v matmul instead of the [S, S] probs.
        row_sum = jnp.sum(p, axis=-1, keepdims=True, dtype=jnp.float32)  # [S, 1]

        # TODO(synk): training-mode attention-probs dropout not implemented
        # (eval-mode forward: dropout == identity).
        ctx_h = jnp.dot(p.astype(compute_dtype), v_h,
                        preferred_element_type=jnp.float32)         # [S, d] f32
        ctx_h = ctx_h * pl.reciprocal(row_sum, approx=True)

        # Scratch-slab write bounds per-head live ranges (no concat/XLU relayout).
        ctx_ref[:, h * d:(h + 1) * d] = ctx_h

    # Single lane-dense store, already in the final [B, S, H] layout.
    out_ref[0] = ctx_ref[...].astype(out_ref.dtype)


def _pick_heads_per_block(num_heads, head_dim, hidden_size, compute_itemsize,
                          weight_vmem_budget=16 << 20):
    """Pick heads-per-group G.

    Prefer a single group (G = num_heads) when the fused QKV weights
    (3*H*H, double-buffered) fit a VMEM budget: the weight index_map becomes
    constant so the weights are DMA'd from HBM exactly once for the whole
    grid, the projection N widens to 3*H, and the output store spans full H.
    Otherwise pick the smallest divisor with G*d % 256 == 0 (fills the
    256-wide MXU on v6e/v7x), then 128 (lane-dense), then all heads.
    """
    fused_w_bytes = 2 * 3 * hidden_size * hidden_size * compute_itemsize
    if fused_w_bytes <= weight_vmem_budget:
        return num_heads
    for align in (256, 128):
        for g in range(1, num_heads + 1):
            if num_heads % g == 0 and (g * head_dim) % align == 0:
                return g
    return num_heads


def _default_probs_dtype(compute_dtype):
    """bf16 exp/probs on v6e/v7x (bf16 EUP/VPU); f32 on v5e (no bf16 VPU/EUP)."""
    try:
        kind = jax.devices()[0].device_kind.lower()
    except Exception:
        return jnp.float32
    if "v5 lite" in kind or "v5e" in kind or "v5litepod" in kind:
        return jnp.float32
    return compute_dtype


def prepare_fused_qkv(params, num_attention_heads, *, compute_dtype=jnp.bfloat16):
    """One-time (cacheable) Q|K|V weight fusion — do NOT redo per forward.

    nn.Linear weight is [out, in]; transpose so the kernel computes x @ w,
    split the out dim into head groups of G, fuse Q|K|V along the out dim,
    and fold the 1/sqrt(d) softmax scale into the Q weights/bias so the kernel
    never multiplies the S x S scores.
    Returns (wqkv [n_groups, H, 3*G*d], bqkv [n_groups, 1, 3*G*d], G).
    """
    H = params["wq"].shape[0]
    nh = num_attention_heads
    assert H % nh == 0, "hidden size must be a multiple of num heads"
    d = H // nh
    G = _pick_heads_per_block(nh, d, H, jnp.dtype(compute_dtype).itemsize)
    n_groups = nh // G
    gd = G * d
    scale = 1.0 / math.sqrt(d)

    def group_w(w, s=1.0):
        wt = (w * s).T                                   # [H_in, H_out]
        return jnp.transpose(wt.reshape(H, n_groups, gd), (1, 0, 2))

    def group_b(b, s=1.0):
        return (b * s).reshape(n_groups, 1, gd)

    wqkv = jnp.concatenate(
        [group_w(params["wq"], scale), group_w(params["wk"]), group_w(params["wv"])],
        axis=-1).astype(compute_dtype)                   # [n_groups, H, 3*G*d]
    bqkv = jnp.concatenate(
        [group_b(params["bq"], scale), group_b(params["bk"]), group_b(params["bv"])],
        axis=-1).astype(jnp.float32)                     # [n_groups, 1, 3*G*d]
    return wqkv, bqkv, G


def bert_self_attention_fused(hidden_states, attention_mask, wqkv, bqkv,
                              num_attention_heads, heads_per_block, *,
                              compute_dtype=jnp.bfloat16, probs_dtype=None):
    """Pallas TPU BertSelfAttention.forward (eval mode, head_mask=None,
    history_state=None, output_attentions=False) with pre-fused QKV params."""
    B, S, H = hidden_states.shape
    nh = num_attention_heads
    d = H // nh
    G = heads_per_block
    n_groups = nh // G
    gd = G * d
    out_dtype = hidden_states.dtype
    cbytes = jnp.dtype(compute_dtype).itemsize
    obytes = jnp.dtype(out_dtype).itemsize

    if probs_dtype is None:
        probs_dtype = _default_probs_dtype(compute_dtype)

    x = hidden_states.astype(compute_dtype)
    mask = attention_mask.astype(jnp.float32)

    kernel = functools.partial(_attn_kernel, heads_per_block=G, head_dim=d,
                               compute_dtype=compute_dtype, probs_dtype=probs_dtype)

    # Explicit VMEM budget: double-buffered blocks + in-kernel temporaries,
    # clamped to 64 MiB (= v7x physical VMEM per TC).
    vmem_est = (2 * S * H * cbytes                      # hidden (double-buffered)
                + 2 * H * 3 * gd * cbytes               # fused weights
                + 2 * 3 * gd * 4 + 2 * S * 4            # bias + mask
                + 2 * S * gd * obytes                   # output
                + S * 3 * gd * (4 + cbytes)             # qkv f32 + compute copy
                + 3 * S * S * 4                         # score / exp temporaries
                + S * gd * 4)                           # ctx scratch slab
    vmem_limit = int(min(max(2 * vmem_est, 32 << 20), 64 << 20))

    cost = pl.CostEstimate(
        flops=B * (6 * S * H * H + 4 * nh * S * S * d),
        transcendentals=B * nh * S * S,
        bytes_accessed=(B * S * H * cbytes + n_groups * H * 3 * gd * cbytes
                        + n_groups * 3 * gd * 4 + B * S * 4 + B * S * H * obytes),
    )

    # Grid (B, n_groups), group axis innermost: the [1, S, H] hidden block
    # (index depends only on b) stays VMEM-resident across head groups, and
    # with G = nh (n_groups == 1) the fused weights are DMA'd exactly once.
    # TODO(synk): for S >~ 1K add a query-tile grid axis (flash-style online
    # softmax) so the score buffer is tile_q x S instead of S x S.
    context = pl.pallas_call(
        kernel,
        out_shape=jax.ShapeDtypeStruct((B, S, H), out_dtype),
        grid_spec=pltpu.PrefetchScalarGridSpec(
            num_scalar_prefetch=0,
            grid=(B, n_groups),
            in_specs=[
                pl.BlockSpec((1, S, H), lambda b, g: (b, 0, 0)),        # hidden
                pl.BlockSpec((1, H, 3 * gd), lambda b, g: (g, 0, 0)),   # fused W
                pl.BlockSpec((1, 1, 3 * gd), lambda b, g: (g, 0, 0)),   # fused b
                pl.BlockSpec((1, 1, 1, S), lambda b, g: (b, 0, 0, 0)),  # mask
            ],
            out_specs=pl.BlockSpec((1, S, gd), lambda b, g: (b, 0, g)),
            scratch_shapes=[pltpu.VMEM((S, gd), jnp.float32)],
        ),
        compiler_params=pltpu.CompilerParams(
            dimension_semantics=("parallel", "parallel"),
            vmem_limit_bytes=vmem_limit),
        cost_estimate=cost,
    )(x, wqkv, bqkv, mask)

    # Output already lands in the final [B, S, nh*d] == [B, S, H] layout.
    return (context,)


def bert_self_attention(hidden_states, attention_mask, params,
                        num_attention_heads, *, compute_dtype=jnp.bfloat16,
                        probs_dtype=None):
    """Convenience wrapper. For repeated inference, call prepare_fused_qkv once
    and reuse (wqkv, bqkv, G) with bert_self_attention_fused instead of
    re-fusing the weights on every call."""
    wqkv, bqkv, G = prepare_fused_qkv(params, num_attention_heads,
                                      compute_dtype=compute_dtype)
    return bert_self_attention_fused(hidden_states, attention_mask, wqkv, bqkv,
                                     num_attention_heads, G,
                                     compute_dtype=compute_dtype,
                                     probs_dtype=probs_dtype)


def _reference(hidden_states, attention_mask, params, nh):
    """Plain-JAX f32 reference mirroring the PyTorch forward (eval mode)."""
    B, S, H = hidden_states.shape
    d = H // nh

    def lin(x, w, b):
        return jnp.einsum("bsh,oh->bso", x, w) + b

    def heads(x):
        return jnp.transpose(x.reshape(B, S, nh, d), (0, 2, 1, 3))

    q = heads(lin(hidden_states, params["wq"], params["bq"]))
    k = heads(lin(hidden_states, params["wk"], params["bk"]))
    v = heads(lin(hidden_states, params["wv"], params["bv"]))
    scores = jnp.einsum("bhqd,bhkd->bhqk", q, k) / math.sqrt(d)
    scores = scores + attention_mask
    probs = jax.nn.softmax(scores, axis=-1)
    ctx = jnp.einsum("bhqk,bhkd->bhqd", probs, v)
    return jnp.transpose(ctx, (0, 2, 1, 3)).reshape(B, S, H)


if __name__ == "__main__":
    # Small config: hidden_size=32, num_attention_heads=4, seq=8, batch=2.
    B, S, H, NH = 2, 8, 32, 4

    key = jax.random.PRNGKey(0)
    k_x, k_wq, k_wk, k_wv, k_bq, k_bk, k_bv, k_m = jax.random.split(key, 8)

    hidden_states = jax.random.normal(k_x, (B, S, H), dtype=jnp.float32)

    # Deterministic parameter init (nn.Linear shapes: weight [out, in], bias [out]).
    scale = 1.0 / math.sqrt(H)
    params = {
        "wq": jax.random.uniform(k_wq, (H, H), jnp.float32, -scale, scale),
        "wk": jax.random.uniform(k_wk, (H, H), jnp.float32, -scale, scale),
        "wv": jax.random.uniform(k_wv, (H, H), jnp.float32, -scale, scale),
        "bq": jax.random.uniform(k_bq, (H,), jnp.float32, -scale, scale),
        "bk": jax.random.uniform(k_bk, (H,), jnp.float32, -scale, scale),
        "bv": jax.random.uniform(k_bv, (H,), jnp.float32, -scale, scale),
    }

    # Additive BERT attention mask [B, 1, 1, S]: mask out the last 2 keys of batch 1.
    keep = jnp.ones((B, S), dtype=jnp.float32).at[1, -2:].set(0.0)
    attention_mask = (1.0 - keep)[:, None, None, :] * -10000.0

    # One-time weight fusion (cacheable across forwards), then the kernel call.
    wqkv, bqkv, G = prepare_fused_qkv(params, NH)
    (context,) = bert_self_attention_fused(hidden_states, attention_mask,
                                           wqkv, bqkv, NH, G)
    context = jax.block_until_ready(context)

    ref = _reference(hidden_states, attention_mask, params, NH)
    assert context.shape == (B, S, H)
    # bf16 MXU operands + bf16 exp + approx reciprocal => compare vs the f32
    # reference at a correspondingly looser (inference-grade) tolerance.
    assert jnp.allclose(context, ref, atol=2e-2, rtol=2e-2), "mismatch vs reference"

    print("KERNEL_OK")
</pallas_src>

<mosaic_0001>
module attributes {stable_mosaic.version = 11 : i64} {
  func.func @_attn_kernel(%arg0: i32, %arg1: i32, %arg2: memref<1x8x32xbf16, #tpu.memory_space<vmem>>, %arg3: memref<1x32x96xbf16, #tpu.memory_space<vmem>>, %arg4: memref<1x1x96xf32, #tpu.memory_space<vmem>>, %arg5: memref<1x1x1x8xf32, #tpu.memory_space<vmem>>, %arg6: memref<1x8x32xf32, #tpu.memory_space<vmem>>, %arg7: memref<8x32xf32, #tpu.memory_space<vmem>>) attributes {dimension_semantics = [#tpu.dimension_semantics<parallel>, #tpu.dimension_semantics<parallel>], iteration_bounds = array<i64: 2, 1>, scalar_prefetch = 0 : i64, scratch_operands = 1 : i64, tpu.core_type = #tpu.core_type<tc>, window_params = [{transform_indices = @transform_0, window_bounds = array<i64: 1, 8, 32>}, {transform_indices = @transform_1, window_bounds = array<i64: 1, 32, 96>}, {transform_indices = @transform_2, window_bounds = array<i64: 1, 1, 96>}, {transform_indices = @transform_3, window_bounds = array<i64: 1, 1, 1, 8>}, {transform_indices = @transform_4, window_bounds = array<i64: 1, 8, 32>}]} {
    %c0 = arith.constant 0 : index
    %c0_0 = arith.constant 0 : index
    %c0_1 = arith.constant 0 : index
    %0 = vector.load %arg2[%c0, %c0_0, %c0_1] : memref<1x8x32xbf16, #tpu.memory_space<vmem>>, vector<1x8x32xbf16>
    %1 = vector.shape_cast %0 : vector<1x8x32xbf16> to vector<8x32xbf16>
    %c0_2 = arith.constant 0 : index
    %c0_3 = arith.constant 0 : index
    %c0_4 = arith.constant 0 : index
    %2 = vector.load %arg3[%c0_2, %c0_3, %c0_4] : memref<1x32x96xbf16, #tpu.memory_space<vmem>>, vector<1x32x96xbf16>
    %3 = vector.shape_cast %2 : vector<1x32x96xbf16> to vector<32x96xbf16>
    %cst = arith.constant dense<0.000000e+00> : vector<8x96xf32>
    %4 = tpu.matmul %1, %3, %cst {dimension_numbers = #tpu.dot_dimension_numbers<[1], [0], [0], [1], [0, 0, 1, 1], [], []>} : vector<8x32xbf16>, vector<32x96xbf16>, vector<8x96xf32> -> vector<8x96xf32>
    %c0_5 = arith.constant 0 : index
    %c0_6 = arith.constant 0 : index
    %c0_7 = arith.constant 0 : index
    %5 = vector.load %arg4[%c0_5, %c0_6, %c0_7] : memref<1x1x96xf32, #tpu.memory_space<vmem>>, vector<1x1x96xf32>
    %6 = vector.shape_cast %5 : vector<1x1x96xf32> to vector<1x96xf32>
    %7 = vector.broadcast %6 : vector<1x96xf32> to vector<8x96xf32>
    %8 = arith.addf %4, %7 : vector<8x96xf32>
    %9 = arith.truncf %8 : vector<8x96xf32> to vector<8x96xbf16>
    %c0_8 = arith.constant 0 : index
    %c0_9 = arith.constant 0 : index
    %c0_10 = arith.constant 0 : index
    %c0_11 = arith.constant 0 : index
    %10 = vector.load %arg5[%c0_8, %c0_9, %c0_10, %c0_11] : memref<1x1x1x8xf32, #tpu.memory_space<vmem>>, vector<1x1x1x8xf32>
    %11 = vector.shape_cast %10 : vector<1x1x1x8xf32> to vector<1x8xf32>
    %12 = vector.extract_strided_slice %9 {offsets = [0, 0], sizes = [8, 8], strides = [1, 1]} : vector<8x96xbf16> to vector<8x8xbf16>
    %13 = vector.extract_strided_slice %9 {offsets = [0, 32], sizes = [8, 8], strides = [1, 1]} : vector<8x96xbf16> to vector<8x8xbf16>
    %14 = vector.extract_strided_slice %9 {offsets = [0, 64], sizes = [8, 8], strides = [1, 1]} : vector<8x96xbf16> to vector<8x8xbf16>
    %cst_12 = arith.constant dense<0.000000e+00> : vector<8x8xf32>
    %15 = tpu.matmul %12, %13, %cst_12 {dimension_numbers = #tpu.dot_dimension_numbers<[1], [1], [0], [0], [0, 0, 1, 0], [], []>} : vector<8x8xbf16>, vector<8x8xbf16>, vector<8x8xf32> -> vector<8x8xf32>
    %16 = vector.broadcast %11 : vector<1x8xf32> to vector<8x8xf32>
    %17 = arith.addf %15, %16 : vector<8x8xf32>
    %cst_13 = arith.constant dense<0xFF800000> : vector<8xf32>
    %18 = vector.multi_reduction <maximumf>, %17, %cst_13 [1] : vector<8x8xf32> to vector<8xf32>
    %19 = vector.shape_cast %18 : vector<8xf32> to vector<8x1xf32>
    %20 = vector.broadcast %19 : vector<8x1xf32> to vector<8x8xf32>
    %21 = arith.subf %17, %20 : vector<8x8xf32>
    %22 = arith.truncf %21 : vector<8x8xf32> to vector<8x8xbf16>
    %23 = math.exp %22 : vector<8x8xbf16>
    %24 = arith.extf %23 : vector<8x8xbf16> to vector<8x8xf32>
    %cst_14 = arith.constant dense<0.000000e+00> : vector<8xf32>
    %25 = vector.multi_reduction <add>, %24, %cst_14 [1] : vector<8x8xf32> to vector<8xf32>
    %26 = vector.shape_cast %25 : vector<8xf32> to vector<8x1xf32>
    %cst_15 = arith.constant dense<0.000000e+00> : vector<8x8xf32>
    %27 = tpu.matmul %23, %14, %cst_15 {dimension_numbers = #tpu.dot_dimension_numbers<[1], [0], [0], [1], [0, 0, 1, 1], [], []>} : vector<8x8xbf16>, vector<8x8xbf16>, vector<8x8xf32> -> vector<8x8xf32>
    %28 = tpu.reciprocal %26 {approx = true} : vector<8x1xf32> -> vector<8x1xf32>
    %29 = vector.broadcast %28 : vector<8x1xf32> to vector<8x8xf32>
    %30 = arith.mulf %27, %29 : vector<8x8xf32>
    %c0_16 = arith.constant 0 : index
    %c0_17 = arith.constant 0 : index
    %31 = vector.load %arg7[%c0_16, %c0_17] : memref<8x32xf32, #tpu.memory_space<vmem>>, vector<8x8xf32>
    tpu.vector_store %arg7[%c0_16, %c0_17], %30 {strides = array<i32>} : memref<8x32xf32, #tpu.memory_space<vmem>>, vector<8x8xf32>,
    %32 = vector.extract_strided_slice %9 {offsets = [0, 8], sizes = [8, 8], strides = [1, 1]} : vector<8x96xbf16> to vector<8x8xbf16>
    %33 = vector.extract_strided_slice %9 {offsets = [0, 40], sizes = [8, 8], strides = [1, 1]} : vector<8x96xbf16> to vector<8x8xbf16>
    %34 = vector.extract_strided_slice %9 {offsets = [0, 72], sizes = [8, 8], strides = [1, 1]} : vector<8x96xbf16> to vector<8x8xbf16>
    %cst_18 = arith.constant dense<0.000000e+00> : vector<8x8xf32>
    %35 = tpu.matmul %32, %33, %cst_18 {dimension_numbers = #tpu.dot_dimension_numbers<[1], [1], [0], [0], [0, 0, 1, 0], [], []>} : vector<8x8xbf16>, vector<8x8xbf16>, vector<8x8xf32> -> vector<8x8xf32>
    %36 = vector.broadcast %11 : vector<1x8xf32> to vector<8x8xf32>
    %37 = arith.addf %35, %36 : vector<8x8xf32>
    %cst_19 = arith.constant dense<0xFF800000> : vector<8xf32>
    %38 = vector.multi_reduction <maximumf>, %37, %cst_19 [1] : vector<8x8xf32> to vector<8xf32>
    %39 = vector.shape_cast %38 : vector<8xf32> to vector<8x1xf32>
    %40 = vector.broadcast %39 : vector<8x1xf32> to vector<8x8xf32>
    %41 = arith.subf %37, %40 : vector<8x8xf32>
    %42 = arith.truncf %41 : vector<8x8xf32> to vector<8x8xbf16>
    %43 = math.exp %42 : vector<8x8xbf16>
    %44 = arith.extf %43 : vector<8x8xbf16> to vector<8x8xf32>
    %cst_20 = arith.constant dense<0.000000e+00> : vector<8xf32>
    %45 = vector.multi_reduction <add>, %44, %cst_20 [1] : vector<8x8xf32> to vector<8xf32>
    %46 = vector.shape_cast %45 : vector<8xf32> to vector<8x1xf32>
    %cst_21 = arith.constant dense<0.000000e+00> : vector<8x8xf32>
    %47 = tpu.matmul %43, %34, %cst_21 {dimension_numbers = #tpu.dot_dimension_numbers<[1], [0], [0], [1], [0, 0, 1, 1], [], []>} : vector<8x8xbf16>, vector<8x8xbf16>, vector<8x8xf32> -> vector<8x8xf32>
    %48 = tpu.reciprocal %46 {approx = true} : vector<8x1xf32> -> vector<8x1xf32>
    %49 = vector.broadcast %48 : vector<8x1xf32> to vector<8x8xf32>
    %50 = arith.mulf %47, %49 : vector<8x8xf32>
    %c0_22 = arith.constant 0 : index
    %c8 = arith.constant 8 : index
    %51 = vector.load %arg7[%c0_22, %c8] : memref<8x32xf32, #tpu.memory_space<vmem>>, vector<8x8xf32>
    tpu.vector_store %arg7[%c0_22, %c8], %50 {strides = array<i32>} : memref<8x32xf32, #tpu.memory_space<vmem>>, vector<8x8xf32>,
    %52 = vector.extract_strided_slice %9 {offsets = [0, 16], sizes = [8, 8], strides = [1, 1]} : vector<8x96xbf16> to vector<8x8xbf16>
    %53 = vector.extract_strided_slice %9 {offsets = [0, 48], sizes = [8, 8], strides = [1, 1]} : vector<8x96xbf16> to vector<8x8xbf16>
    %54 = vector.extract_strided_slice %9 {offsets = [0, 80], sizes = [8, 8], strides = [1, 1]} : vector<8x96xbf16> to vector<8x8xbf16>
    %cst_23 = arith.constant dense<0.000000e+00> : vector<8x8xf32>
    %55 = tpu.matmul %52, %53, %cst_23 {dimension_numbers = #tpu.dot_dimension_numbers<[1], [1], [0], [0], [0, 0, 1, 0], [], []>} : vector<8x8xbf16>, vector<8x8xbf16>, vector<8x8xf32> -> vector<8x8xf32>
    %56 = vector.broadcast %11 : vector<1x8xf32> to vector<8x8xf32>
    %57 = arith.addf %55, %56 : vector<8x8xf32>
    %cst_24 = arith.constant dense<0xFF800000> : vector<8xf32>
    %58 = vector.multi_reduction <maximumf>, %57, %cst_24 [1] : vector<8x8xf32> to vector<8xf32>
    %59 = vector.shape_cast %58 : vector<8xf32> to vector<8x1xf32>
    %60 = vector.broadcast %59 : vector<8x1xf32> to vector<8x8xf32>
    %61 = arith.subf %57, %60 : vector<8x8xf32>
    %62 = arith.truncf %61 : vector<8x8xf32> to vector<8x8xbf16>
    %63 = math.exp %62 : vector<8x8xbf16>
    %64 = arith.extf %63 : vector<8x8xbf16> to vector<8x8xf32>
    %cst_25 = arith.constant dense<0.000000e+00> : vector<8xf32>
    %65 = vector.multi_reduction <add>, %64, %cst_25 [1] : vector<8x8xf32> to vector<8xf32>
    %66 = vector.shape_cast %65 : vector<8xf32> to vector<8x1xf32>
    %cst_26 = arith.constant dense<0.000000e+00> : vector<8x8xf32>
    %67 = tpu.matmul %63, %54, %cst_26 {dimension_numbers = #tpu.dot_dimension_numbers<[1], [0], [0], [1], [0, 0, 1, 1], [], []>} : vector<8x8xbf16>, vector<8x8xbf16>, vector<8x8xf32> -> vector<8x8xf32>
    %68 = tpu.reciprocal %66 {approx = true} : vector<8x1xf32> -> vector<8x1xf32>
    %69 = vector.broadcast %68 : vector<8x1xf32> to vector<8x8xf32>
    %70 = arith.mulf %67, %69 : vector<8x8xf32>
    %c0_27 = arith.constant 0 : index
    %c16 = arith.constant 16 : index
    %71 = vector.load %arg7[%c0_27, %c16] : memref<8x32xf32, #tpu.memory_space<vmem>>, vector<8x8xf32>
    tpu.vector_store %arg7[%c0_27, %c16], %70 {strides = array<i32>} : memref<8x32xf32, #tpu.memory_space<vmem>>, vector<8x8xf32>,
    %72 = vector.extract_strided_slice %9 {offsets = [0, 24], sizes = [8, 8], strides = [1, 1]} : vector<8x96xbf16> to vector<8x8xbf16>
    %73 = vector.extract_strided_slice %9 {offsets = [0, 56], sizes = [8, 8], strides = [1, 1]} : vector<8x96xbf16> to vector<8x8xbf16>
    %74 = vector.extract_strided_slice %9 {offsets = [0, 88], sizes = [8, 8], strides = [1, 1]} : vector<8x96xbf16> to vector<8x8xbf16>
    %cst_28 = arith.constant dense<0.000000e+00> : vector<8x8xf32>
    %75 = tpu.matmul %72, %73, %cst_28 {dimension_numbers = #tpu.dot_dimension_numbers<[1], [1], [0], [0], [0, 0, 1, 0], [], []>} : vector<8x8xbf16>, vector<8x8xbf16>, vector<8x8xf32> -> vector<8x8xf32>
    %76 = vector.broadcast %11 : vector<1x8xf32> to vector<8x8xf32>
    %77 = arith.addf %75, %76 : vector<8x8xf32>
    %cst_29 = arith.constant dense<0xFF800000> : vector<8xf32>
    %78 = vector.multi_reduction <maximumf>, %77, %cst_29 [1] : vector<8x8xf32> to vector<8xf32>
    %79 = vector.shape_cast %78 : vector<8xf32> to vector<8x1xf32>
    %80 = vector.broadcast %79 : vector<8x1xf32> to vector<8x8xf32>
    %81 = arith.subf %77, %80 : vector<8x8xf32>
    %82 = arith.truncf %81 : vector<8x8xf32> to vector<8x8xbf16>
    %83 = math.exp %82 : vector<8x8xbf16>
    %84 = arith.extf %83 : vector<8x8xbf16> to vector<8x8xf32>
    %cst_30 = arith.constant dense<0.000000e+00> : vector<8xf32>
    %85 = vector.multi_reduction <add>, %84, %cst_30 [1] : vector<8x8xf32> to vector<8xf32>
    %86 = vector.shape_cast %85 : vector<8xf32> to vector<8x1xf32>
    %cst_31 = arith.constant dense<0.000000e+00> : vector<8x8xf32>
    %87 = tpu.matmul %83, %74, %cst_31 {dimension_numbers = #tpu.dot_dimension_numbers<[1], [0], [0], [1], [0, 0, 1, 1], [], []>} : vector<8x8xbf16>, vector<8x8xbf16>, vector<8x8xf32> -> vector<8x8xf32>
    %88 = tpu.reciprocal %86 {approx = true} : vector<8x1xf32> -> vector<8x1xf32>
    %89 = vector.broadcast %88 : vector<8x1xf32> to vector<8x8xf32>
    %90 = arith.mulf %87, %89 : vector<8x8xf32>
    %c0_32 = arith.constant 0 : index
    %c24 = arith.constant 24 : index
    %91 = vector.load %arg7[%c0_32, %c24] : memref<8x32xf32, #tpu.memory_space<vmem>>, vector<8x8xf32>
    tpu.vector_store %arg7[%c0_32, %c24], %90 {strides = array<i32>} : memref<8x32xf32, #tpu.memory_space<vmem>>, vector<8x8xf32>,
    %c0_33 = arith.constant 0 : index
    %c0_34 = arith.constant 0 : index
    %92 = vector.load %arg7[%c0_33, %c0_34] : memref<8x32xf32, #tpu.memory_space<vmem>>, vector<8x32xf32>
    %c0_35 = arith.constant 0 : index
    %c0_36 = arith.constant 0 : index
    %c0_37 = arith.constant 0 : index
    %93 = vector.load %arg6[%c0_35, %c0_36, %c0_37] : memref<1x8x32xf32, #tpu.memory_space<vmem>>, vector<1x8x32xf32>
    %94 = vector.shape_cast %93 : vector<1x8x32xf32> to vector<8x32xf32>
    %95 = vector.shape_cast %92 : vector<8x32xf32> to vector<1x8x32xf32>
    tpu.vector_store %arg6[%c0_35, %c0_36, %c0_37], %95 {strides = array<i32>} : memref<1x8x32xf32, #tpu.memory_space<vmem>>, vector<1x8x32xf32>,
    return
  }
  func.func @transform_0(%arg0: i32, %arg1: i32) -> (i32, i32, i32) {
    %c0_i32 = arith.constant 0 : i32
    %c0_i32_0 = arith.constant 0 : i32
    %c0_i32_1 = arith.constant 0 : i32
    return %arg0, %c0_i32, %c0_i32_0 : i32, i32, i32
  }
  func.func @transform_1(%arg0: i32, %arg1: i32) -> (i32, i32, i32) {
    %c0_i32 = arith.constant 0 : i32
    %c0_i32_0 = arith.constant 0 : i32
    %c0_i32_1 = arith.constant 0 : i32
    return %arg1, %c0_i32, %c0_i32_0 : i32, i32, i32
  }
  func.func @transform_2(%arg0: i32, %arg1: i32) -> (i32, i32, i32) {
    %c0_i32 = arith.constant 0 : i32
    %c0_i32_0 = arith.constant 0 : i32
    %c0_i32_1 = arith.constant 0 : i32
    return %arg1, %c0_i32, %c0_i32_0 : i32, i32, i32
  }
  func.func @transform_3(%arg0: i32, %arg1: i32) -> (i32, i32, i32, i32) {
    %c0_i32 = arith.constant 0 : i32
    %c0_i32_0 = arith.constant 0 : i32
    %c0_i32_1 = arith.constant 0 : i32
    %c0_i32_2 = arith.constant 0 : i32
    return %arg0, %c0_i32, %c0_i32_0, %c0_i32_1 : i32, i32, i32, i32
  }
  func.func @transform_4(%arg0: i32, %arg1: i32) -> (i32, i32, i32) {
    %c0_i32 = arith.constant 0 : i32
    %c0_i32_0 = arith.constant 0 : i32
    return %arg0, %c0_i32, %arg1 : i32, i32, i32
  }
}

</mosaic_0001>

<bundles_post_ra>
// kernel: tpu_custom_call.1
= control target key start
LH: loop header
LB: loop body
LE: loop exit
PB: predicated region body
PF: predicated region fallthrough
CT: control target
= control target key end

     0   :  { %s1602_s0 = inlined_call_operand.hbm [shape: bf16[2,8,32], index: 0, kind: input, shape index: {}]   ;;  %s1603_s1 = inlined_call_operand.hbm [shape: bf16[1,32,96], index: 1, kind: input, shape index: {}]   ;;  %s1604_s2 = inlined_call_operand.vmem [shape: f32[1,1,96], index: 2, kind: input, shape index: {}]   ;;  %s1605_s3 = inlined_call_operand.vmem [shape: f32[2,1,1,8], index: 3, kind: input, shape index: {}]   ;;  %s1606_s4 = inlined_call_operand.hbm [shape: f32[2,8,32], index: 4, kind: output, shape index: {}]  }
   0x1   :  { %1608 = sst [smem:[#allocation12_spill]] %s1603_s1 }
   0x2   :  { %9 = vsyncpa [#allocation4], 0 }
   0x3   :  { %11 = vsyncpa [#allocation4 + $0x1], 0 }
   0x4   :  { %12 = vsyncpa [#allocation7], 0 }
   0x5   :  { %13 = vsyncpa [#allocation5], 0 }
   0x6   :  { %15 = vsyncpa [#allocation5 + $0x1], 0  ;;  %s1351_s15 = smov 0   ;;  %s1353_s16 = smov 0  }
   0x7   :  { %s1355_s17 = smov 0   ;;  %s1357_s18 = smov 0  }
   0x8   :  { %s1359_s19 = smov 0   ;;  %s1361_s20 = smov 0  }
   0x9 LB: > { %s952_s21 = sadd.s32 4294967295, %s1303_s20   ;;  %s953_s22 = sadd.s32 4294967294, %s1303_s20   ;;  %s1303_s20 = sphi %s1361_s20, %s21_s20   ;;  %s1299_s19 = sphi %s1359_s19, %s1626_s19   ;;  %s1295_s18 = sphi %s1357_s18, %s1625_s18   ;;  %s1291_s17 = sphi %s1355_s17, %s1624_s17   ;;  %s1287_s16 = sphi %s1353_s16, %s1623_s16   ;;  %s1283_s15 = sphi %s1351_s15, %s1622_s15  }
   0xa   : > { %p53_p0 = scmp.ne.s32.totalorder %s1287_s16, %s1283_s15  ;;  %p1385_p1 = scmp.eq.s32.totalorder %s952_s21, 0 }
   0xb   : > { %p1389_p2 = scmp.eq.s32.totalorder %s952_s21, 1  ;;  %p163_p3 = scmp.eq.s32.totalorder %s953_s22, 1 }
   0xc   : > { %p1395_p4 = por %p1385_p1, %p53_p0  ;;  %p954_p5 = scmp.ge.s32.totalorder %s1303_s20, 1 }
   0xd   : > { %p1400_p6 = por %p163_p3, %p53_p0  ;;  %p170_p7 = scmp.lt.s32.totalorder %s1303_s20, 3 }
   0xe   : > { %s1611_s25 = scalar_select %p1395_p4, 1, 0 }
   0xf   : > { %s1612_s26 = scalar_select %p1400_p6, 1, 0 }
  0x10   : > { %p1405_p8 = pnand %p954_p5, %p170_p7  ;;  %s1305_s28 = smov [#allocation6]  }
  0x11   : > { %s185_s29 = sshll.u32 %s1305_s28, 4  ;;  %s33_s5 = sadd.s32 1, %s1299_s19  ;;  %s186_s29 = int_to_ptr.vmem [resolvable:$true] %s185_s29 }
  0x12   : > { %p1064_p9 = pneg %p1405_p8  ;;  %s1176_s6 = scalar_lea.vmem %s186_s29, 256 }
  0x13   : > { %p1177_p13 = scmp.ne.s32.totalorder %s186_s29, %s1176_s6  ;;  %p1184_p5 = scmp.lt.s32.totalorder %s186_s29, %s186_s29 }
  0x14   : > { %p1414_p11 = pnand %p1064_p9, %p1385_p1  ;;  %p1185_p7 = scmp.lt.s32.totalorder %s1176_s6, %s1176_s6 }
  0x16   : > { %p1167_p12 = pneg %p1414_p11  ;;  %p1186_p6 = por %p1185_p7, %p1184_p5 }
  0x18   : > { %p1179_p0 = pnand %p1177_p13, %p1167_p12 }
  0x1a   : > { %p1180_p3 = pneg %p1179_p0 }
  0x1c   : > { %p1187_p4 = pnand %p1186_p6, %p1180_p3 }
  0x1e   : > { %1190 = shalt.err (!%p1187_p4)
}
  0x1f   : > { %s1306_s7 = smov 64   ;;  %s1307_s8 = smov 4  }
  0x20   : > { %s1615_s1 = sld [smem:[#allocation12_spill]]  ;;  %p35_p6 = scmp.ge.s32.totalorder %s33_s5, 2 }
  0x21   : > { %s40_s11 = sadd.s32 1, %s1291_s17  ;;  %p47_p4 = scmp.ne.s32.totalorder %s1291_s17, %s1287_s16 }
  0x22   : > { %p48_p9 = scmp.eq.s32.totalorder %s1303_s20, 0  ;;  %s1628_s5 = smov (%p35_p6, %s33_s5), 0 }
  0x23   : > { %p1438_p13 = por %p1389_p2, %p47_p4  ;;  %s37_s14 = ssub.s32 %s1299_s19, %s1628_s5 }
  0x24   : > { %p1432_p12 = por %p48_p9, %p47_p4  ;;  %p1077_p0 = scmp.lt.s32.totalorder %s1303_s20, 2 }
  0x25   : > { %s205_s21 = sand.u32 1, %s1291_s17  }
  0x26   : > { %1067 = dma.hbm_to_vmem [thread:$0]  (!%p1414_p11), %s1615_s1, 256, %s186_s29, [#allocation7], %s1306_s7, %s1306_s7, %s1307_s8  }
  0x27   : > { %p38_p11 = scmp.eq.s32.totalorder %s37_s14, 0  ;;  %s958_s22 = sshll.u32 %s205_s21, 2 }
  0x28   : > { %s959_s29 = sshll.u32 %s1299_s19, 6  ;;  %s209_s8 = scalar_lea.vmem [#allocation3], %s958_s22 }
  0x29   : > { %s1447_s28 = scalar_select %p38_p11, %s1291_s17, %s40_s11  }
  0x2a   : > { %s214_s7 = scalar_lea.hbm %s1602_s0, %s959_s29  ;;  %s216_s9 = sshll.u32 %s209_s8, 4  ;;  %s217_s9 = int_to_ptr.vmem [resolvable:$true] %s216_s9 }
  0x2b   : > { %p1455_p2 = pnand %p1077_p0, %p1432_p12  ;;  %s206_s10 = scalar_lea.sflag [#allocation4], %s205_s21 }
  0x2c   : > { %s1204_s14 = scalar_lea.vmem %s217_s9, 64  ;;  %s1308_s11 = smov [#allocation3]  }
  0x2d   : > { %p1193_p3 = pneg %p1455_p2  ;;  %p1205_p5 = scmp.ne.s32.totalorder %s217_s9, %s1204_s14 }
  0x2e   : > { %s1209_s1 = sshll.u32 %s1308_s11, 4  ;;  %s1210_s1 = int_to_ptr.vmem [resolvable:$false] %s1209_s1 }
  0x2f   : > { %p1207_p7 = pnand %p1205_p5, %p1193_p3  ;;  %s1211_s29 = scalar_lea.vmem %s1210_s1, 128 }
  0x30   : > { %p1212_p4 = scmp.lt.s32.totalorder %s217_s9, %s1210_s1  ;;  %p1213_p9 = scmp.lt.s32.totalorder %s1211_s29, %s1204_s14 }
  0x31   : > { %p1208_p6 = pneg %p1207_p7 }
  0x32   : > { %p1214_p11 = por %p1213_p9, %p1212_p4 }
  0x34   : > { %p1215_p10 = pnand %p1214_p11, %p1208_p6 }
  0x36   : > { %1218 = shalt.err (!%p1215_p10)
}
  0x37   : > { %1071 = dma.hbm_to_vmem [thread:$0]  (!%p1455_p2), %s214_s7, 64, %s217_s9, %s206_s10  }
  0x38   : > { %231 = sbr.rel (%p1405_p8) target bundleno = 1133 (0x46d), region = 36  ;;  %s1466_s12 = sand.u32 (!%p1405_p8), 1, %s1287_s16  }
  0x39   : > { %s961_s21 = sshll.u32 (!%p1405_p8), %s1466_s12, 2  ;;  %s234_s22 = scalar_lea.sflag (!%p1405_p8), [#allocation4], %s1466_s12 }
  0x3a   : > { %s237_s30 = scalar_lea.vmem (!%p1405_p8), [#allocation3], %s961_s21  ;;  %p1619_p12 = scmp.ne.s32.totalorder (!%p1405_p8), %s1611_s25, 0 }
  0x3d   : > { %1270 = dma.done.wait (%p1619_p12), %s234_s22, 64  }
  0x3e   : > { %1272 = vsyncadd (%p1619_p12), %s234_s22, 4294967232 }
  0x3f   : > { %1274 = dma.done.wait (%p1385_p1), [#allocation7], 256  }
  0x40   : > { %1276 = vsyncadd (%p1385_p1), [#allocation7], 4294967040  ;;  %v1309_v0 = vmov 0.0   ;;  %vm1310_vm0 = vmmov 0   ;;  %v1147_v1 = vld [vmem:[#allocation6 + $0x8] sm:$0xff]   ;;  %v1148_v2 = vld [vmem:[#allocation6] sm:$0xff]  }
  0x41   : > { %1000 = vmatprep.subr.bf16.mxu0 %v1309_v0  ;;  %1004 = vmatprep.mubr.msk.bf16.mxu0 %vm1310_vm0, %v1309_v0  ;;  %v279_v3 = vld [vmem:[%s237_s30] sm:$0xf]  ;;  %vm303_vm1 = vcmask 261120   ;;  %v964_v4 = vld [vmem:[%s1604_s2] ss:$0 sm:$0xff]  ;;  %s1311_s25 = smov 120  }
  0x42   : > { %1008 = vmatprep.subr.bf16.mxu1 %v1309_v0  ;;  %1010 = vmatprep.mubr.msk.bf16.mxu1 %vm1310_vm0, %v1309_v0  ;;  %s1312_s27 = smov 96   ;;  %s1313_s6 = smov 80   ;;  %vm358_vm2 = vcmask 64512   ;;  %vm422_vm3 = vcmask 1043456   ;;  %vm585_vm4 = vcmask 130112   ;;  %vm703_vm5 = vcmask 195712  }
  0x43   : > { %1001 = vmatpush3.bf16.msra.mxu0 %v1147_v1  ;;  %s1314_s7 = smov 88   ;;  %s1315_s8 = smov 72   ;;  %vm821_vm6 = vcmask 261312  }
  0x44   : > { %1002 = vmatprep.subr.bf16.mxu0 %v1309_v0  ;;  %s1316_s9 = smov 112   ;;  %s1317_s24 = smov 104  }
  0x45   : > { %p275_p1 = scmp.lt.s32.totalorder %s1295_s18, 1  ;;  %s1318_s21 = smov 56  }
  0x46   : > { %s1319_s22 = smov 64   ;;  %s1320_s30 = smov 40  }
  0x47   : > { %1003 = vmatpush3.bf16.msra.mxu0 %v1148_v2  ;;  %s276_s10 = scalar_select %p275_p1, %s1295_s18, 1 }
  0x48   : > { %1014 = vmatprep.subr.bf16.mxu0 %v1309_v0  ;;  %s1321_s1 = smov 48   ;;  %s1322_s23 = smov 8  }
  0x49   : > { %s277_s29 = scalar_lea.vmem %s1605_s3, %s276_s10  ;;  %s826_s11 = scalar_lea.sflag [#allocation5], %s1466_s12 }
  0x4a   : > { %1005 = vmatmul.mubr.msk.bf16.vlgmr.msra.gmra.mxu0 %vm303_vm1, %v279_v3  ;;  %v968_v22 = vld [vmem:[%s277_s29] ss:$0 sm:$0xff] }
  0x4b   : > { %1016 = vmatprep.mubr.msk.bf16.mxu0 %vm1310_vm0, %v1309_v0 }
 0x10a   : > { %v341_v5 = vpop.f32.mrf.mxu0 }
 0x10b   : > { %v342_v6 = vadd.f32 %v964_v4, %v341_v5 }
 0x10c   : > { %v1006_v7 = vpop.f32.mrf.mxu0 }
 0x10d   : > { %v1492_v8 = vpack.c.bf16 %v342_v6, %v342_v6 }
 0x10e   : > { %v344_v9 = vpop.f32.mrf.mxu0 }
 0x10f   : > { %469 = vrot.lane.b32.xlu1 %v1492_v8, %s1311_s25  ;;  %356 = vrot.lane.b32.xlu0 %v1492_v8, %s1312_s27  ;;  %s1323_s25 = smov 16   ;;  %s1324_s27 = smov 24  }
 0x110   : > { %v1007_v10 = vpop.f32.mrf.mxu0 }
 0x113   : > { %589 = vrot.lane.b32.xlu1 %v1492_v8, %s1313_s6  ;;  %471 = vrot.lane.b32.xlu0 %v1492_v8, %s1314_s7  ;;  %s963_s6 = sshll.u32 %s1466_s12, 3  ;;  %s978_s7 = sshll.u32 %s1295_s18, 7 }
 0x114   : > { %s1559_s14 = scalar_lea.hbm %s1606_s4, %s978_s7 }
 0x117   : > { %707 = vrot.lane.b32.xlu1 %v1492_v8, %s1315_s8  ;;  %587 = vrot.lane.b32.xlu0 %v1492_v8, %s1316_s9  ;;  %s271_s8 = scalar_lea.vmem [#allocation8], %s963_s6 }
 0x118   : > { %s840_s9 = sshll.u32 %s271_s8, 4  ;;  %s841_s9 = int_to_ptr.vmem [resolvable:$true] %s840_s9 }
 0x119   : > { %s1219_s29 = scalar_lea.vmem %s841_s9, 128 }
 0x11a   : > { %p1220_p8 = scmp.ne.s32.totalorder %s841_s9, %s1219_s29 }
 0x11b   : > { %705 = vrot.lane.b32.xlu0 %v1492_v8, %s1317_s24 }
 0x11c   : > { %p1221_p10 = pnand %p1220_p8, %p1438_p13 }
 0x11e   : > { %p1222_p0 = pneg %p1221_p10 }
 0x181   : > { %v357_v11 = vpop.permute.xlu0 %356  ;;  %v470_v14 = vpop.permute.xlu1 %469 }
 0x182   : > { %v363_v12 = vsel %vm358_vm2, %v357_v11, 0 }
 0x183   : > { %1009 = vmatpush3.bf16.xpose.msra.mxu1 %v363_v12 }
 0x184   : > { %1020 = vmatprep.subr.bf16.mxu1 %v1309_v0 }
 0x185   : > { %v472_v13 = vpop.permute.xlu0 %471  ;;  %v590_v16 = vpop.permute.xlu1 %589 }
 0x186   : > { %v477_v15 = vsel %vm358_vm2, %v472_v13, 0  ;;  %v595_v17 = vsel %vm358_vm2, %v590_v16, 0 }
 0x189   : > { %v708_v18 = vpop.permute.xlu1 %707  ;;  %v588_v19 = vpop.permute.xlu0 %587 }
 0x18a   : > { %1011 = vmatmul.mubr.msk.bf16.vlgmr.msra.gmra.mxu1 %vm358_vm2, %v1492_v8  ;;  %v713_v20 = vsel %vm358_vm2, %v708_v18, 0 }
 0x18b   : > { %1021 = vmatpush3.bf16.xpose.msra.mxu1 %v477_v15  ;;  %1022 = vmatprep.mubr.msk.bf16.mxu1 %vm1310_vm0, %v1309_v0 }
 0x18c   : > { %1032 = vmatprep.subr.bf16.mxu1 %v1309_v0 }
 0x18d   : > { %v706_v21 = vpop.permute.xlu0 %705 }
 0x192   : > { %1023 = vmatmul.mubr.msk.bf16.vlgmr.msra.gmra.mxu1 %vm358_vm2, %v470_v14 }
 0x193   : > { %1033 = vmatpush3.bf16.xpose.msra.mxu1 %v595_v17  ;;  %1034 = vmatprep.mubr.msk.bf16.mxu1 %vm1310_vm0, %v1309_v0 }
 0x194   : > { %1044 = vmatprep.subr.bf16.mxu1 %v1309_v0 }
 0x19a   : > { %1035 = vmatmul.mubr.msk.bf16.vlgmr.msra.gmra.mxu1 %vm358_vm2, %v588_v19 }
 0x19b   : > { %1045 = vmatpush3.bf16.xpose.msra.mxu1 %v713_v20  ;;  %1046 = vmatprep.mubr.msk.bf16.mxu1 %vm1310_vm0, %v1309_v0 }
 0x1a2   : > { %1047 = vmatmul.mubr.msk.bf16.vlgmr.msra.gmra.mxu1 %vm358_vm2, %v706_v21 }
 0x24a   : > { %v399_v23 = vpop.f32.mrf.mxu1 }
 0x24b   : > { %v400_v24 = vadd.f32 %v968_v22, %v399_v23 }
 0x24c   : > { %v1012_v25 = vpop.f32.mrf.mxu1 }
 0x24d   : > { %v405_v26 = vsel %vm358_vm2, %v400_v24, -inf }
 0x24e   : > { %406 = vmax.xlane.f32.xlu1 %v405_v26  ;;  %v402_v27 = vpop.f32.mrf.mxu1 }
 0x250   : > { %v1013_v28 = vpop.f32.mrf.mxu1 }
 0x252   : > { %v513_v29 = vpop.f32.mrf.mxu1 }
 0x253   : > { %v514_v30 = vadd.f32 %v968_v22, %v513_v29 }
 0x254   : > { %v1024_v31 = vpop.f32.mrf.mxu1 }
 0x255   : > { %v519_v32 = vsel %vm358_vm2, %v514_v30, -inf }
 0x256   : > { %520 = vmax.xlane.f32.xlu0 %v519_v32  ;;  %v516_v33 = vpop.f32.mrf.mxu1 }
 0x258   : > { %v1025_v34 = vpop.f32.mrf.mxu1 }
 0x25a   : > { %v631_v35 = vpop.f32.mrf.mxu1 }
 0x25b   : > { %v632_v36 = vadd.f32 %v968_v22, %v631_v35 }
 0x25c   : > { %v1036_v37 = vpop.f32.mrf.mxu1 }
 0x25d   : > { %v637_v38 = vsel %vm358_vm2, %v632_v36, -inf }
 0x25e   : > { %638 = vmax.xlane.f32.xlu0 %v637_v38  ;;  %v634_v39 = vpop.f32.mrf.mxu1 }
 0x25f   : > { %531 = vrot.lane.b32.xlu1 %v1492_v8, %s1318_s21  ;;  %s1325_s21 = smov [#allocation8]  }
 0x260   : > { %v1037_v40 = vpop.f32.mrf.mxu1 }
 0x262   : > { %v749_v41 = vpop.f32.mrf.mxu1 }
 0x263   : > { %v750_v45 = vadd.f32 %v968_v22, %v749_v41 }
 0x264   : > { %v1048_v42 = vpop.f32.mrf.mxu1 }
 0x265   : > { %v755_v46 = vsel %vm358_vm2, %v750_v45, -inf }
 0x266   : > { %v752_v43 = vpop.f32.mrf.mxu1 }
 0x268   : > { %v1049_v44 = vpop.f32.mrf.mxu1 }
 0x274   : > { %417 = vrot.lane.b32.xlu0 %v1492_v8, %s1319_s22  ;;  %s1223_s22 = sshll.u32 %s1325_s21, 4  ;;  %s1224_s22 = int_to_ptr.vmem [resolvable:$false] %s1223_s22 }
 0x275   : > { %s1225_s18 = scalar_lea.vmem %s1224_s22, 256  ;;  %p1226_p2 = scmp.lt.s32.totalorder %s841_s9, %s1224_s22 }
 0x276   : > { %p1227_p3 = scmp.lt.s32.totalorder %s1225_s18, %s1219_s29 }
 0x278   : > { %767 = vrot.lane.b32.xlu0 %v1492_v8, %s1320_s30  ;;  %p1228_p5 = por %p1227_p3, %p1226_p2 }
 0x27a   : > { %p1229_p7 = pnand %p1228_p5, %p1222_p0 }
 0x283   : > { %756 = vmax.xlane.f32.xlu1 %v755_v46 }
 0x294   : > { %649 = vrot.lane.b32.xlu1 %v1492_v8, %s1321_s1 }
 0x2d7   : > { %v407_v47 = vpop.xlane.xlu1 %406 }
 0x2d8   : > { %v408_v48 = vsub.f32 %v400_v24, %v407_v47 }
 0x2da   : > { %v409_v49 = vpack.c.bf16 %v408_v48, %v408_v48 }
 0x2db   : > { %v532_v61 = vpop.permute.xlu1 %531 }
 0x2dc   : > { %v411_v50 = vmul.bf16 1069105081, %v409_v49  ;;  %v537_v63 = vsel %vm422_vm3, %v532_v61, 0 }
 0x2de   : > { %1149 = vpow.bf16 %v411_v50 }
 0x2df   : > { %v521_v51 = vpop.xlane.xlu0 %520 }
 0x2e0   : > { %v522_v52 = vsub.f32 %v514_v30, %v521_v51 }
 0x2e2   : > { %v523_v53 = vpack.c.bf16 %v522_v52, %v522_v52 }
 0x2e4   : > { %v525_v54 = vmul.bf16 1069105081, %v523_v53 }
 0x2e6   : > { %1151 = vpow.bf16 %v525_v54 }
 0x2e7   : > { %v639_v55 = vpop.xlane.xlu0 %638 }
 0x2e8   : > { %v640_v56 = vsub.f32 %v632_v36, %v639_v55 }
 0x2ea   : > { %v641_v57 = vpack.c.bf16 %v640_v56, %v640_v56 }
 0x2eb   : > { %v418_v58 = vpop.permute.xlu0 %417 }
 0x2ec   : > { %v643_v59 = vmul.bf16 1069105081, %v641_v57  ;;  %v424_v60 = vsel %vm422_vm3, %v418_v58, 0  ;;  %v1150_v62 = vpop.eup %1149 }
 0x2ed   : > { %1015 = vmatpush3.bf16.msra.mxu0 %v424_v60  ;;  %v413_v4 = vunpack.c.l.bf16 %v1150_v62 }
 0x2ee   : > { %1153 = vpow.bf16 %v643_v59  ;;  %1026 = vmatprep.subr.bf16.mxu0 %v1309_v0 }
 0x2ef   : > { %v414_v5 = vsel %vm358_vm2, %v413_v4, 0.0  ;;  %v768_v15 = vpop.permute.xlu0 %767 }
 0x2f0   : > { %1017 = vmatmul.mubr.msk.bf16.vlgmr.msra.gmra.mxu0 %vm358_vm2, %v1150_v62  ;;  %v773_v16 = vsel %vm422_vm3, %v768_v15, 0 }
 0x2f1   : > { %1027 = vmatpush3.bf16.msra.mxu0 %v537_v63  ;;  %1028 = vmatprep.mubr.msk.bf16.mxu0 %vm1310_vm0, %v1309_v0 }
 0x2f2   : > { %1038 = vmatprep.subr.bf16.mxu0 %v1309_v0 }
 0x2f4   : > { %v1152_v1 = vpop.eup %1151 }
 0x2f5   : > { %v527_v2 = vunpack.c.l.bf16 %v1152_v1 }
 0x2f7   : > { %v528_v3 = vsel %vm358_vm2, %v527_v2, 0.0 }
 0x2f8   : > { %529 = vadd.xlane.f32.xlu1 %v528_v3  ;;  %1029 = vmatmul.mubr.msk.bf16.vlgmr.msra.gmra.mxu0 %vm358_vm2, %v1152_v1 }
 0x2f9   : > { %1040 = vmatprep.mubr.msk.bf16.mxu0 %vm1310_vm0, %v1309_v0 }
 0x2fc   : > { %v1154_v6 = vpop.eup %1153  ;;  %415 = vadd.xlane.f32.xlu1 %v414_v5 }
 0x2fd   : > { %v645_v7 = vunpack.c.l.bf16 %v1154_v6 }
 0x2ff   : > { %v646_v8 = vsel %vm358_vm2, %v645_v7, 0.0 }
 0x300   : > { %647 = vadd.xlane.f32.xlu0 %v646_v8 }
 0x30c   : > { %v757_v9 = vpop.xlane.xlu1 %756 }
 0x30d   : > { %v758_v10 = vsub.f32 %v750_v45, %v757_v9 }
 0x30f   : > { %v759_v11 = vpack.c.bf16 %v758_v10, %v758_v10 }
 0x310   : > { %v650_v12 = vpop.permute.xlu1 %649 }
 0x311   : > { %v761_v13 = vmul.bf16 1069105081, %v759_v11  ;;  %v655_v14 = vsel %vm422_vm3, %v650_v12, 0 }
 0x312   : > { %1039 = vmatpush3.bf16.msra.mxu0 %v655_v14 }
 0x313   : > { %1155 = vpow.bf16 %v761_v13  ;;  %1050 = vmatprep.subr.bf16.mxu0 %v1309_v0 }
 0x315   : > { %1041 = vmatmul.mubr.msk.bf16.vlgmr.msra.gmra.mxu0 %vm358_vm2, %v1154_v6 }
 0x316   : > { %1051 = vmatpush3.bf16.msra.mxu0 %v773_v16  ;;  %1052 = vmatprep.mubr.msk.bf16.mxu0 %vm1310_vm0, %v1309_v0 }
 0x321   : > { %v1156_v17 = vpop.eup %1155 }
 0x322   : > { %1053 = vmatmul.mubr.msk.bf16.vlgmr.msra.gmra.mxu0 %vm358_vm2, %v1156_v17  ;;  %v763_v18 = vunpack.c.l.bf16 %v1156_v17 }
 0x324   : > { %v764_v19 = vsel %vm358_vm2, %v763_v18, 0.0 }
 0x325   : > { %765 = vadd.xlane.f32.xlu0 %v764_v19 }
 0x381   : > { %v530_v20 = vpop.xlane.xlu1 %529 }
 0x385   : > { %v416_v21 = vpop.xlane.xlu1 %415 }
 0x386   : > { %1157 = vrcp.f32 %v416_v21 }
 0x387   : > { %1159 = vrcp.f32 %v530_v20 }
 0x389   : > { %v648_v33 = vpop.xlane.xlu0 %647 }
 0x38a   : > { %1161 = vrcp.f32 %v648_v33 }
 0x393   : > { %v1158_v22 = vpop.eup %1157 }
 0x394   : > { %v1160_v0 = vpop.eup %1159 }
 0x397   : > { %v1162_v35 = vpop.eup %1161 }
 0x3ae   : > { %v766_v34 = vpop.xlane.xlu0 %765 }
 0x3af   : > { %1163 = vrcp.f32 %v766_v34 }
 0x3b0   : > { %v460_v23 = vpop.f32.mrf.mxu0 }
 0x3b1   : > { %v467_v24 = vmul.f32 %v1158_v22, %v460_v23 }
 0x3b2   : > { %v1018_v25 = vpop.f32.mrf.mxu0 }
 0x3b3   : > { %468 = vst.msk [vmem:[#allocation2] sm:$0xff] %vm358_vm2, %v467_v24 }
 0x3b4   : > { %v463_v26 = vpop.f32.mrf.mxu0 }
 0x3b6   : > { %v1019_v27 = vpop.f32.mrf.mxu0 }
 0x3b8   : > { %v573_v28 = vpop.f32.mrf.mxu0 }
 0x3b9   : > { %v580_v29 = vmul.f32 %v1160_v0, %v573_v28 }
 0x3ba   : > { %v1030_v30 = vpop.f32.mrf.mxu0 }
 0x3bb   : > { %582 = vrot.lane.b32.xlu0 %v580_v29, %s1322_s23 }
 0x3bc   : > { %v576_v31 = vpop.f32.mrf.mxu0  ;;  %v1164_v41 = vpop.eup %1163 }
 0x3be   : > { %v1031_v32 = vpop.f32.mrf.mxu0 }
 0x3d5   : > { %v691_v36 = vpop.f32.mrf.mxu0 }
 0x3d6   : > { %v698_v37 = vmul.f32 %v1162_v35, %v691_v36 }
 0x3d7   : > { %v1042_v38 = vpop.f32.mrf.mxu0 }
 0x3d8   : > { %700 = vrot.lane.b32.xlu1 %v698_v37, %s1323_s25 }
 0x3d9   : > { %v694_v39 = vpop.f32.mrf.mxu0 }
 0x3db   : > { %v1043_v40 = vpop.f32.mrf.mxu0 }
 0x3e2   : > { %v809_v42 = vpop.f32.mrf.mxu0 }
 0x3e3   : > { %v816_v43 = vmul.f32 %v1164_v41, %v809_v42 }
 0x3e4   : > { %v1054_v44 = vpop.f32.mrf.mxu0 }
 0x3e5   : > { %818 = vrot.lane.b32.xlu1 %v816_v43, %s1324_s27 }
 0x3e6   : > { %v812_v45 = vpop.f32.mrf.mxu0 }
 0x3e8   : > { %v1055_v46 = vpop.f32.mrf.mxu0 }
 0x42d   : > { %v583_v47 = vpop.permute.xlu0 %582 }
 0x42e   : > { %586 = vst.msk [vmem:[#allocation2] sm:$0xff] %vm585_vm4, %v583_v47 }
 0x44a   : > { %v701_v48 = vpop.permute.xlu1 %700 }
 0x44b   : > { %704 = vst.msk [vmem:[#allocation2] sm:$0xff] %vm703_vm5, %v701_v48 }
 0x457   : > { %v819_v49 = vpop.permute.xlu1 %818 }
 0x458   : > { %822 = vst.msk [vmem:[#allocation2] sm:$0xff] %vm821_vm6, %v819_v49 }
 0x45f   : > { %v823_v50 = vld [vmem:[#allocation2] sm:$0xff] }
 0x460   : > { %824 = vst.msk [vmem:[%s271_s8] sm:$0xff] %vm303_vm1, %v823_v50 }
 0x461   : > { %1232 = shalt.err (!%p1229_p7)
}
 0x462   : > { %s1233_s30 = scalar_lea.hbm %s1559_s14, 128  ;;  %s1237_s23 = scalar_lea.hbm %s1606_s4, 256 }
 0x463   : > { %p1234_p6 = scmp.ne.s32.totalorder %s1559_s14, %s1233_s30  ;;  %p1238_p11 = scmp.lt.s32.totalorder %s1559_s14, %s1606_s4 }
 0x464   : > { %p1239_p12 = scmp.lt.s32.totalorder %s1237_s23, %s1233_s30 }
 0x465   : > { %p1235_p4 = pnand %p1234_p6, %p1438_p13 }
 0x466   : > { %p1240_p1 = por %p1239_p12, %p1238_p11 }
 0x467   : > { %p1236_p9 = pneg %p1235_p4 }
 0x469   : > { %p1241_p8 = pnand %p1240_p1, %p1236_p9 }
 0x46b   : > { %1244 = shalt.err (!%p1241_p8)
}
 0x46c   : > { %1062 = dma.vmem_to_hbm [thread:$0]  (%p1438_p13), %s841_s9, 128, %s1559_s14, %s826_s11  }
 0x46d PF: > { %s852_s6 = sand.u32 1, %s1283_s15   ;;  %p1620_p10 = scmp.ne.s32.totalorder %s1612_s26, 0 }
 0x46e   : > { %p1621_p0 = scmp.ge.s32.totalorder %s1303_s20, 2  ;;  %s853_s7 = scalar_lea.sflag [#allocation5], %s852_s6 }
 0x470   : > { %p1073_p2 = pnand %p1621_p0, %p1620_p10 }
 0x472   : > { %p1074_p3 = pneg %p1073_p2 }
 0x474   : > { %1278 = dma.done.wait (%p1074_p3), %s853_s7, 128  }
 0x475   : > { %1280 = vsyncadd (%p1074_p3), %s853_s7, 4294967168  ;;  %s21_s20 = sadd.s32 1, %s1303_s20   ;;  %s1622_s15 = smov %s1287_s16 }
 0x476   : > { %p18_p5 = scmp.ge.s32.totalorder %s21_s20, 4   ;;  %s1623_s16 = smov %s1291_s17 }
 0x477   : > { %s1624_s17 = smov %s1447_s28  ;;  %s1625_s18 = smov %s1299_s19 }
 0x478   : > { %s1626_s19 = smov %s1628_s5  ;;  %20 = sbr.rel (!%p18_p5) target bundleno = 9 (0x9), region = 92 }
 0x47d   :  { %858 = vsyncpa [#allocation4], 1 }
 0x47e   :  { %860 = vsyncpa [#allocation4 + $0x1], 1 }
 0x47f   :  { %861 = vsyncpa [#allocation7], 1 }
 0x480   :  { %862 = vsyncpa [#allocation5], 1 }
 0x481   :  { %864 = vsyncpa [#allocation5 + $0x1], 1 }

</bundles_post_ra>
